<compile_context>
chip_gen: v6e
topology: v6e:2x2x1
jax: 0.10.0
libtpu: 0.0.40
codegen_flags: <defaults>
</compile_context>

<pallas_src>
import functools

import jax
import jax.numpy as jnp
from jax.experimental import pallas as pl
from jax.experimental.pallas import tpu as pltpu


def _layernorm_kernel(x_ref, gamma_ref, beta_ref, o_ref, *, epsilon, n_feat):
    # x_ref:              (Bn, F)  -- Bn samples, F = C*H*W (lane-dense)
    # gamma_ref/beta_ref: (1, F)   -- grid-invariant parameters
    x = x_ref[...].astype(jnp.float32)

    n = jnp.float32(n_feat)
    # Row-wise (per-sample) reductions over the lane-dense last axis.
    mu = jnp.sum(x, axis=-1, keepdims=True) / n
    d = x - mu
    # torch.Tensor.var default is the unbiased estimator (divide by N-1),
    # which is what the reference module uses.
    var = jnp.sum(d * d, axis=-1, keepdims=True) / jnp.float32(n_feat - 1)
    inv_std = jax.lax.rsqrt(var + jnp.float32(epsilon))  # EUP slot (cheap)

    g = gamma_ref[...].astype(jnp.float32)
    b = beta_ref[...].astype(jnp.float32)
    o_ref[...] = (d * inv_std * g + b).astype(o_ref.dtype)


def _choose_block_rows(n_rows, n_feat, itemsize, target_bytes=2 << 20):
    """Pick rows-per-block so each block is ~target_bytes (amortize step cost)."""
    rows = max(1, target_bytes // max(1, n_feat * itemsize))
    if rows >= n_rows:
        return int(n_rows)
    if rows >= 8:
        rows = (rows // 8) * 8  # keep the sublane dim a clean multiple of 8
    return int(rows)


def layer_norm(x, gamma, beta, epsilon=1e-5):
    """x: (N, C, H, W); gamma, beta: (C, H, W). Returns (N, C, H, W)."""
    N, C, H, W = x.shape
    assert gamma.shape == (C, H, W) and beta.shape == (C, H, W)
    F = C * H * W

    # Lane-dense layout: flatten the normalized dims into the last axis.
    x2 = x.reshape(N, F)
    g2 = gamma.reshape(1, F)
    b2 = beta.reshape(1, F)

    bn = _choose_block_rows(N, F, x.dtype.itemsize)
    grid = (pl.cdiv(N, bn),)

    # Explicit VMEM budget: double-buffered x-in + out blocks, params once,
    # plus slack. Kept well under v7x's 64 MiB physical VMEM.
    block_bytes = bn * F * x.dtype.itemsize
    param_bytes = F * (g2.dtype.itemsize + b2.dtype.itemsize)
    vmem_limit = int(min(max(4 * block_bytes + 2 * param_bytes + (4 << 20),
                             16 << 20), 48 << 20))

    kernel = functools.partial(_layernorm_kernel, epsilon=epsilon, n_feat=F)

    out = pl.pallas_call(
        kernel,
        out_shape=jax.ShapeDtypeStruct((N, F), x.dtype),
        grid_spec=pltpu.PrefetchScalarGridSpec(
            num_scalar_prefetch=0,
            grid=grid,
            in_specs=[
                pl.BlockSpec((bn, F), lambda i: (i, 0)),
                pl.BlockSpec((1, F), lambda i: (0, 0)),  # gamma: fetched once
                pl.BlockSpec((1, F), lambda i: (0, 0)),  # beta:  fetched once
            ],
            out_specs=pl.BlockSpec((bn, F), lambda i: (i, 0)),
        ),
        compiler_params=pltpu.CompilerParams(
            dimension_semantics=("parallel",),
            vmem_limit_bytes=vmem_limit,
        ),
    )(x2, g2, b2)
    return out.reshape(N, C, H, W)


def layer_norm_ref(x, gamma, beta, epsilon=1e-5):
    xf = x.astype(jnp.float32)
    mu = jnp.mean(xf, axis=(-1, -2, -3), keepdims=True)
    n = x.shape[-1] * x.shape[-2] * x.shape[-3]
    var = jnp.sum((xf - mu) ** 2, axis=(-1, -2, -3), keepdims=True) / (n - 1)
    x_hat = (xf - mu) / jnp.sqrt(var + epsilon)
    return (x_hat * gamma + beta).astype(x.dtype)


if __name__ == "__main__":
    # Small shapes consistent with the module: normalized_shape = [C, H, W].
    N, C, H, W = 2, 4, 16, 16   # C*H*W = 1024 -> exactly 8 lane-dense vregs/row
    key = jax.random.PRNGKey(0)
    x = jax.random.normal(key, (N, C, H, W), dtype=jnp.float32)

    # Deterministic parameter init, matching the module's __init__:
    gamma = jnp.ones((C, H, W), dtype=jnp.float32)
    beta = jnp.zeros((C, H, W), dtype=jnp.float32)

    out = layer_norm(x, gamma, beta, epsilon=1e-5)
    out = jax.block_until_ready(out)

    ref = layer_norm_ref(x, gamma, beta, epsilon=1e-5)
    assert out.shape == (N, C, H, W)
    assert jnp.allclose(out, ref, atol=1e-5, rtol=1e-5)

    print("KERNEL_OK")
</pallas_src>

<mosaic_0001>
module attributes {stable_mosaic.version = 11 : i64} {
  func.func @_layernorm_kernel(%arg0: i32, %arg1: memref<2x1024xf32, #tpu.memory_space<vmem>>, %arg2: memref<1x1024xf32, #tpu.memory_space<vmem>>, %arg3: memref<1x1024xf32, #tpu.memory_space<vmem>>, %arg4: memref<2x1024xf32, #tpu.memory_space<vmem>>) attributes {dimension_semantics = [#tpu.dimension_semantics<parallel>], iteration_bounds = array<i64: 1>, scalar_prefetch = 0 : i64, scratch_operands = 0 : i64, tpu.core_type = #tpu.core_type<tc>, window_params = [{transform_indices = @transform_0, window_bounds = array<i64: 2, 1024>}, {pipeline_mode = #tpu.pipeline_mode<synchronous>, transform_indices = @transform_1, window_bounds = array<i64: 1, 1024>}, {pipeline_mode = #tpu.pipeline_mode<synchronous>, transform_indices = @transform_2, window_bounds = array<i64: 1, 1024>}, {transform_indices = @transform_3, window_bounds = array<i64: 2, 1024>}]} {
    %c0 = arith.constant 0 : index
    %c0_0 = arith.constant 0 : index
    %0 = vector.load %arg1[%c0, %c0_0] : memref<2x1024xf32, #tpu.memory_space<vmem>>, vector<2x1024xf32>
    %cst = arith.constant dense<0.000000e+00> : vector<2xf32>
    %1 = vector.multi_reduction <add>, %0, %cst [1] : vector<2x1024xf32> to vector<2xf32>
    %2 = vector.shape_cast %1 : vector<2xf32> to vector<2x1xf32>
    %cst_1 = arith.constant 1.024000e+03 : f32
    %3 = vector.broadcast %cst_1 : f32 to vector<2x1xf32>
    %4 = arith.divf %2, %3 : vector<2x1xf32>
    %5 = vector.broadcast %4 : vector<2x1xf32> to vector<2x1024xf32>
    %6 = arith.subf %0, %5 : vector<2x1024xf32>
    %7 = arith.mulf %6, %6 : vector<2x1024xf32>
    %cst_2 = arith.constant dense<0.000000e+00> : vector<2xf32>
    %8 = vector.multi_reduction <add>, %7, %cst_2 [1] : vector<2x1024xf32> to vector<2xf32>
    %9 = vector.shape_cast %8 : vector<2xf32> to vector<2x1xf32>
    %cst_3 = arith.constant 1.023000e+03 : f32
    %10 = vector.broadcast %cst_3 : f32 to vector<2x1xf32>
    %11 = arith.divf %9, %10 : vector<2x1xf32>
    %cst_4 = arith.constant 9.99999974E-6 : f32
    %12 = vector.broadcast %cst_4 : f32 to vector<2x1xf32>
    %13 = arith.addf %11, %12 : vector<2x1xf32>
    %14 = math.rsqrt %13 : vector<2x1xf32>
    %c0_5 = arith.constant 0 : index
    %c0_6 = arith.constant 0 : index
    %15 = vector.load %arg2[%c0_5, %c0_6] : memref<1x1024xf32, #tpu.memory_space<vmem>>, vector<1x1024xf32>
    %c0_7 = arith.constant 0 : index
    %c0_8 = arith.constant 0 : index
    %16 = vector.load %arg3[%c0_7, %c0_8] : memref<1x1024xf32, #tpu.memory_space<vmem>>, vector<1x1024xf32>
    %17 = vector.broadcast %14 : vector<2x1xf32> to vector<2x1024xf32>
    %18 = arith.mulf %6, %17 : vector<2x1024xf32>
    %19 = vector.broadcast %15 : vector<1x1024xf32> to vector<2x1024xf32>
    %20 = arith.mulf %18, %19 : vector<2x1024xf32>
    %21 = vector.broadcast %16 : vector<1x1024xf32> to vector<2x1024xf32>
    %22 = arith.addf %20, %21 : vector<2x1024xf32>
    %c0_9 = arith.constant 0 : index
    %c0_10 = arith.constant 0 : index
    %23 = vector.load %arg4[%c0_9, %c0_10] : memref<2x1024xf32, #tpu.memory_space<vmem>>, vector<2x1024xf32>
    tpu.vector_store %arg4[%c0_9, %c0_10], %22 {strides = array<i32>} : memref<2x1024xf32, #tpu.memory_space<vmem>>, vector<2x1024xf32>,
    return
  }
  func.func @transform_0(%arg0: i32) -> (i32, i32) {
    %c0_i32 = arith.constant 0 : i32
    %c0_i32_0 = arith.constant 0 : i32
    return %arg0, %c0_i32 : i32, i32
  }
  func.func @transform_1(%arg0: i32) -> (i32, i32) {
    %c0_i32 = arith.constant 0 : i32
    %c0_i32_0 = arith.constant 0 : i32
    %c0_i32_1 = arith.constant 0 : i32
    return %c0_i32, %c0_i32_0 : i32, i32
  }
  func.func @transform_2(%arg0: i32) -> (i32, i32) {
    %c0_i32 = arith.constant 0 : i32
    %c0_i32_0 = arith.constant 0 : i32
    %c0_i32_1 = arith.constant 0 : i32
    return %c0_i32, %c0_i32_0 : i32, i32
  }
  func.func @transform_3(%arg0: i32) -> (i32, i32) {
    %c0_i32 = arith.constant 0 : i32
    %c0_i32_0 = arith.constant 0 : i32
    return %arg0, %c0_i32 : i32, i32
  }
}

</mosaic_0001>

<bundles_post_ra>
// kernel: tpu_custom_call.1
= control target key start
LH: loop header
LB: loop body
LE: loop exit
PB: predicated region body
PF: predicated region fallthrough
CT: control target
= control target key end

     0   :  { %8 = vsyncpa [#allocation3], 0  ;;  %s561_s0 = inlined_call_operand.hbm [shape: f32[2,1024], index: 0, kind: input, shape index: {}]   ;;  %s562_s1 = inlined_call_operand.hbm [shape: f32[1,1024], index: 1, kind: input, shape index: {}]   ;;  %s563_s2 = inlined_call_operand.hbm [shape: f32[1,1024], index: 2, kind: input, shape index: {}]   ;;  %s564_s3 = inlined_call_operand.hbm [shape: f32[2,1024], index: 3, kind: output, shape index: {}]  }
   0x1   :  { %9 = vsyncpa [#allocation6], 0 }
   0x2   :  { %10 = vsyncpa [#allocation4], 0  ;;  %s463_s12 = smov [#allocation5]   ;;  %s464_s14 = smov [#allocation2]  }
   0x3   :  { %s27_s13 = sshll.u32 %s463_s12, 4  ;;  %s17_s15 = sshll.u32 %s464_s14, 4  ;;  %s28_s13 = int_to_ptr.vmem [resolvable:$true] %s27_s13  ;;  %s18_s15 = int_to_ptr.vmem [resolvable:$true] %s17_s15 }
   0x4   :  { %s385_s16 = scalar_lea.vmem %s28_s13, 128  ;;  %p390_p1 = scmp.lt.s32.totalorder %s28_s13, %s28_s13 }
   0x5   :  { %p386_p0 = scmp.ne.s32.totalorder %s28_s13, %s385_s16  ;;  %p391_p2 = scmp.lt.s32.totalorder %s385_s16, %s385_s16 }
   0x7   :  { %p392_p3 = por %p391_p2, %p390_p1 }
   0x9   :  { %p393_p4 = pnand %p392_p3, %p386_p0 }
   0xb   :  { %396 = shalt.err (!%p393_p4)
}
   0xc   :  { %30 = dma.hbm_to_vmem [thread:$0]  %s562_s1, 128, %s28_s13, [#allocation6]  }
   0xd   :  { %s405_s19 = scalar_lea.vmem %s18_s15, 256  ;;  %p410_p6 = scmp.lt.s32.totalorder %s18_s15, %s18_s15 }
   0xe   :  { %p406_p5 = scmp.ne.s32.totalorder %s18_s15, %s405_s19  ;;  %p411_p7 = scmp.lt.s32.totalorder %s405_s19, %s405_s19 }
  0x10   :  { %p412_p8 = por %p411_p7, %p410_p6 }
  0x12   :  { %p413_p9 = pnand %p412_p8, %p406_p5 }
  0x14   :  { %416 = shalt.err (!%p413_p9)
}
  0x15   :  { %20 = dma.hbm_to_vmem [thread:$0]  %s561_s0, 256, %s18_s15, [#allocation3]  }
  0x16   :  { %s465_s22 = smov [#allocation7]  }
  0x17   :  { %s37_s23 = sshll.u32 %s465_s22, 4  ;;  %s38_s23 = int_to_ptr.vmem [resolvable:$true] %s37_s23 }
  0x18   :  { %s425_s24 = scalar_lea.vmem %s38_s23, 128  ;;  %p430_p11 = scmp.lt.s32.totalorder %s38_s23, %s38_s23 }
  0x19   :  { %p426_p10 = scmp.ne.s32.totalorder %s38_s23, %s425_s24  ;;  %p431_p12 = scmp.lt.s32.totalorder %s425_s24, %s425_s24 }
  0x1b   :  { %p432_p13 = por %p431_p12, %p430_p11 }
  0x1d   :  { %p433_p0 = pnand %p432_p13, %p426_p10 }
  0x1f   :  { %436 = shalt.err (!%p433_p0)
}
  0x20   :  { %40 = dma.hbm_to_vmem [thread:$0]  %s563_s2, 128, %s38_s23, [#allocation6]  }
  0x21   :  { %457 = dma.done.wait [#allocation3], 256  }
  0x22   :  { %458 = vsyncadd [#allocation3], 4294967040 }
  0x23   :  { %459 = dma.done.wait [#allocation6], 256  }
  0x24   :  { %460 = vsyncadd [#allocation6], 4294967040  ;;  %v58_v0 = vlaneseq  ;;  %v466_v1 = vmov 1983009808   ;;  %v50_v6 = vld [vmem:[#allocation2] sm:$0xff]  ;;  %v51_v7 = vld [vmem:[#allocation2 + $0x8] sm:$0xff] }
  0x25   :  { %v56_v2 = vunpack.c.l.s4 %v466_v1  ;;  %v54_v8 = vcombine.high %v50_v6, %v50_v6  ;;  %vm96_vm0 = vcmask 1041408   ;;  %v71_v12 = vcombine.high %v51_v7, %v51_v7  ;;  %s468_s0 = smov [#allocation8]  }
  0x26   :  { %v498_v3 = vshrl.u32 %v58_v0, 7  ;;  %v467_v33 = vmov 269488144   ;;  %s357_s2 = sshll.u32 %s468_s0, 4  ;;  %s358_s2 = int_to_ptr.vmem [resolvable:$true] %s357_s2 }
  0x27   :  { %v57_v4 = vunpack.c.0.s8 %v56_v2  ;;  %v118_v34 = vunpack.c.l.s4 %v467_v33  ;;  %s437_s26 = scalar_lea.vmem %s358_s2, 256  ;;  %p442_p2 = scmp.lt.s32.totalorder %s358_s2, %s358_s2 }
  0x28   :  { %p438_p1 = scmp.ne.s32.totalorder %s358_s2, %s437_s26  ;;  %p443_p3 = scmp.lt.s32.totalorder %s437_s26, %s437_s26 }
  0x29   :  { %v501_v5 = vsub.s32 %v57_v4, %v498_v3  ;;  %v119_v35 = vunpack.c.0.s8 %v118_v34 }
  0x2a   :  { %p444_p4 = por %p443_p3, %p442_p2 }
  0x2b   :  { %v61_v9 = vrot.slane %v50_v6, %v501_v5  ;;  %v68_v10 = vrot.slane %v54_v8, %v501_v5  ;;  %v78_v13 = vrot.slane %v51_v7, %v501_v5  ;;  %v85_v19 = vrot.slane %v71_v12, %v501_v5 }
  0x2c   :  { %v516_v36 = vsub.s32 %v119_v35, %v498_v3  ;;  %v222_v12 = vsub.s32 3, %v498_v3  ;;  %p445_p5 = pnand %p444_p4, %p438_p1 }
  0x2d   :  { %v69_v11 = vcombine.high %v61_v9, %v61_v9  ;;  %v97_v14 = vsel %vm96_vm0, %v61_v9, 0.0  ;;  %v70_v15 = vcombine.high %v68_v10, %v68_v10  ;;  %v100_v17 = vsel %vm96_vm0, %v68_v10, 0.0 }
  0x2e   :  { %v86_v20 = vcombine.high %v78_v13, %v78_v13  ;;  %v104_v23 = vsel %vm96_vm0, %v78_v13, 0.0  ;;  %v87_v25 = vcombine.high %v85_v19, %v85_v19  ;;  %v108_v28 = vsel %vm96_vm0, %v85_v19, 0.0  ;;  %v195_v19 = vld [vmem:[#allocation7] sm:$0xff] }
  0x2f   :  { %v98_v16 = vsel %vm96_vm0, %v69_v11, 0.0  ;;  %v102_v21 = vsel %vm96_vm0, %v70_v15, 0.0  ;;  %v210_v9 = vsub.s32 0, %v498_v3  ;;  %v214_v10 = vsub.s32 1, %v498_v3  ;;  %v194_v15 = vld [vmem:[#allocation5] sm:$0xff] }
  0x30   :  { %v99_v18 = vadd.f32 %v98_v16, %v97_v14  ;;  %v106_v26 = vsel %vm96_vm0, %v86_v20, 0.0  ;;  %v110_v30 = vsel %vm96_vm0, %v87_v25, 0.0  ;;  %v218_v11 = vsub.s32 2, %v498_v3 }
  0x31   :  { %v226_v13 = vsub.s32 4, %v498_v3  ;;  %v230_v16 = vsub.s32 5, %v498_v3  ;;  %v211_v20 = vrot.slane %v194_v15, %v210_v9 }
  0x32   :  { %v101_v22 = vadd.f32 %v100_v17, %v99_v18  ;;  %v234_v17 = vsub.s32 6, %v498_v3  ;;  %v238_v18 = vsub.s32 7, %v498_v3 }
  0x33   :  { %v231_v25 = vrot.slane %v194_v15, %v230_v16  ;;  %v302_v33 = vrot.slane %v195_v19, %v230_v16 }
  0x34   :  { %v103_v24 = vadd.f32 %v102_v21, %v101_v22  ;;  %v215_v21 = vrot.slane %v194_v15, %v214_v10  ;;  %v219_v22 = vrot.slane %v194_v15, %v218_v11  ;;  %v306_v34 = vrot.slane %v195_v19, %v234_v17 }
  0x35   :  { %v310_v35 = vrot.slane %v195_v19, %v238_v18 }
  0x36   :  { %v105_v27 = vadd.f32 %v104_v23, %v103_v24  ;;  %v223_v23 = vrot.slane %v194_v15, %v222_v12  ;;  %v227_v24 = vrot.slane %v194_v15, %v226_v13 }
  0x38   :  { %v107_v29 = vadd.f32 %v106_v26, %v105_v27  ;;  %v235_v26 = vrot.slane %v194_v15, %v234_v17  ;;  %v239_v27 = vrot.slane %v194_v15, %v238_v18  ;;  %v241_v3 = vcombine.low %v219_v22, %v223_v23 }
  0x3a   :  { %v109_v31 = vadd.f32 %v108_v28, %v107_v29  ;;  %v282_v28 = vrot.slane %v195_v19, %v210_v9  ;;  %v286_v29 = vrot.slane %v195_v19, %v214_v10 }
  0x3c   :  { %v111_v32 = vadd.f32 %v110_v30, %v109_v31  ;;  %v290_v30 = vrot.slane %v195_v19, %v218_v11  ;;  %v294_v31 = vrot.slane %v195_v19, %v222_v12 }
  0x3e   :  { %112 = vadd.xlane.f32.xlu0 %v111_v32  ;;  %v298_v32 = vrot.slane %v195_v19, %v226_v13 }
  0xc7   :  { %v113_v37 = vpop.xlane.xlu0 %112 }
  0xc8   :  { %v115_v38 = vmul.f32 0.0009765625, %v113_v37  ;;  %v240_v37 = vcombine.low %v211_v20, %v215_v21 }
  0xca   :  { %v123_v39 = vrot.slane %v115_v38, %v516_v36  ;;  %v257_v38 = vcombine.low %v227_v24, %v231_v25 }
  0xcc   :  { %v519_v40 = vsub.f32 %v50_v6, %v123_v39  ;;  %v521_v41 = vsub.f32 %v51_v7, %v123_v39  ;;  %v258_v39 = vcombine.low %v235_v26, %v239_v27 }
  0xce   :  { %v127_v42 = vmul.f32 %v519_v40, %v519_v40  ;;  %v128_v43 = vmul.f32 %v521_v41, %v521_v41 }
  0xd0   :  { %v131_v44 = vcombine.high %v127_v42, %v127_v42  ;;  %v138_v45 = vrot.slane %v127_v42, %v501_v5  ;;  %v155_v48 = vrot.slane %v128_v43, %v501_v5  ;;  %v148_v52 = vcombine.high %v128_v43, %v128_v43 }
  0xd1   :  { %v311_v42 = vcombine.low %v282_v28, %v286_v29  ;;  %v312_v43 = vcombine.low %v290_v30, %v294_v31 }
  0xd2   :  { %v145_v46 = vrot.slane %v131_v44, %v501_v5  ;;  %v146_v47 = vcombine.high %v138_v45, %v138_v45  ;;  %v173_v49 = vsel %vm96_vm0, %v138_v45, 0.0  ;;  %v162_v56 = vrot.slane %v148_v52, %v501_v5 }
  0xd3   :  { %v163_v57 = vcombine.high %v155_v48, %v155_v48  ;;  %v180_v60 = vsel %vm96_vm0, %v155_v48, 0.0  ;;  %v328_v44 = vcombine.low %v298_v32, %v302_v33  ;;  %v329_v45 = vcombine.low %v306_v34, %v310_v35 }
  0xd4   :  { %v174_v50 = vsel %vm96_vm0, %v146_v47, 0.0  ;;  %v147_v51 = vcombine.high %v145_v46, %v145_v46  ;;  %v176_v54 = vsel %vm96_vm0, %v145_v46, 0.0  ;;  %v164_v62 = vcombine.high %v162_v56, %v162_v56 }
  0xd5   :  { %v175_v53 = vadd.f32 %v174_v50, %v173_v49  ;;  %v182_v63 = vsel %vm96_vm0, %v163_v57, 0.0  ;;  %v184_v1 = vsel %vm96_vm0, %v162_v56, 0.0  ;;  %v248_v46 = vrot.slane %v240_v37, %v501_v5 }
  0xd6   :  { %v178_v58 = vsel %vm96_vm0, %v147_v51, 0.0  ;;  %v186_v4 = vsel %vm96_vm0, %v164_v62, 0.0  ;;  %v255_v47 = vrot.slane %v241_v3, %v501_v5  ;;  %v265_v48 = vrot.slane %v257_v38, %v501_v5 }
  0xd7   :  { %v177_v55 = vadd.f32 %v176_v54, %v175_v53  ;;  %v272_v49 = vrot.slane %v258_v39, %v501_v5  ;;  %v319_v50 = vrot.slane %v311_v42, %v501_v5  ;;  %v326_v51 = vrot.slane %v312_v43, %v501_v5 }
  0xd8   :  { %v336_v52 = vrot.slane %v328_v44, %v501_v5  ;;  %v343_v53 = vrot.slane %v329_v45, %v501_v5  ;;  %v256_v56 = vcombine.low %v248_v46, %v255_v47 }
  0xd9   :  { %v179_v59 = vadd.f32 %v178_v58, %v177_v55  ;;  %v273_v57 = vcombine.low %v265_v48, %v272_v49 }
  0xdb   :  { %v181_v61 = vadd.f32 %v180_v60, %v179_v59  ;;  %v327_v60 = vcombine.low %v319_v50, %v326_v51 }
  0xdd   :  { %v183_v0 = vadd.f32 %v182_v63, %v181_v61  ;;  %v344_v61 = vcombine.low %v336_v52, %v343_v53 }
  0xdf   :  { %v185_v2 = vadd.f32 %v184_v1, %v183_v0 }
  0xe1   :  { %v187_v6 = vadd.f32 %v186_v4, %v185_v2 }
  0xe3   :  { %188 = vadd.xlane.f32.xlu0 %v187_v6 }
 0x16c   :  { %v189_v7 = vpop.xlane.xlu0 %188 }
 0x16d   :  { %v191_v8 = vmul.f32 0.0009775171, %v189_v7 }
 0x16f   :  { %v192_v14 = vadd.f32 1e-05, %v191_v8 }
 0x171   :  { %375 = vrsqrt.f32 %v192_v14 }
 0x17e   :  { %v376_v54 = vpop.eup %375 }
 0x17f   :  { %v203_v55 = vrot.slane %v376_v54, %v516_v36 }
 0x181   :  { %v205_v58 = vmul.f32 %v203_v55, %v519_v40  ;;  %v206_v59 = vmul.f32 %v203_v55, %v521_v41 }
 0x183   :  { %v276_v62 = vmul.f32 %v256_v56, %v205_v58  ;;  %v277_v63 = vmul.f32 %v273_v57, %v206_v59 }
 0x185   :  { %v347_v0 = vadd.f32 %v327_v60, %v276_v62  ;;  %v348_v1 = vadd.f32 %v344_v61, %v277_v63 }
 0x187   :  { %349 = vst [vmem:[#allocation8] sm:$0xff] %v347_v0  ;;  %350 = vst [vmem:[#allocation8 + $0x8] sm:$0xff] %v348_v1 }
 0x188   :  { %448 = shalt.err (!%p445_p5)
}
 0x189   :  { %360 = dma.vmem_to_hbm [thread:$0]  %s358_s2, 256, %s564_s3, [#allocation4]  }
 0x18a   :  { %461 = dma.done.wait [#allocation4], 256  }
 0x18b   :  { %462 = vsyncadd [#allocation4], 4294967040 }
 0x18c   :  { %364 = vsyncpa [#allocation3], 1 }
 0x18d   :  { %365 = vsyncpa [#allocation6], 1 }
 0x18e   :  { %366 = vsyncpa [#allocation4], 1 }

</bundles_post_ra>
